<compile_context>
chip_gen: v7x
topology: tpu7x:2x2x1
jax: 0.10.0
libtpu: 0.0.40
codegen_flags: <defaults>
</compile_context>

<pallas_src>
import functools
import math

import jax
import jax.numpy as jnp
from jax.experimental import pallas as pl
from jax.experimental.pallas import tpu as pltpu

_LANE = 128
_SUBLANE = 8


def _round_up(x, m):
    return ((x + m - 1) // m) * m


def _vmem_budget_bytes():
    """~80% of this generation's physical VMEM (queried once at import)."""
    cap = 64 * 1024 * 1024
    try:
        info = pltpu.get_tpu_info()
        cap = int(getattr(info, "vmem_capacity_bytes", cap) or cap)
    except Exception:
        pass
    return int(cap * 0.8)


_VMEM_BUDGET = _vmem_budget_bytes()


def _vmem_estimate(block_b, block_q, len_q, len_k, d_k, d_v,
                   qkv_bytes, mask_bytes, attn_bytes):
    """Rough per-step VMEM footprint: double-buffered streams + f32 temporaries."""
    bqp = _round_up(block_q, _SUBLANE)
    lkp = _round_up(len_k, _LANE)
    dkp = _round_up(d_k, _LANE)
    dvp = _round_up(d_v, _LANE)
    lks = _round_up(len_k, _SUBLANE)
    dks = _round_up(d_k, _SUBLANE)
    total = 0
    total += 2 * block_b * bqp * dkp * qkv_bytes    # q tile
    total += 2 * block_b * dks * lkp * qkv_bytes    # k^T tile (lane-dense)
    total += 2 * block_b * lks * dvp * qkv_bytes    # v tile
    total += 2 * block_b * bqp * dvp * 4            # out tile
    total += 2 * block_b * bqp * lkp * attn_bytes   # attn tile
    total += 2 * block_b * bqp * lkp * mask_bytes   # mask tile
    total += 2 * block_b * bqp * lkp * 4            # scores / exp temporaries
    return total


def _pick_blocks(sz_b, len_q, len_k, d_k, d_v, qkv_bytes, mask_bytes, budget):
    # Group several batch entries per grid step when per-batch work is tiny
    # (amortizes per-step overhead on TGAT's native small shapes).
    block_b = max(1, min(sz_b, 512 // max(len_q, 1)))
    est = functools.partial(_vmem_estimate, len_q=len_q, len_k=len_k, d_k=d_k,
                            d_v=d_v, qkv_bytes=qkv_bytes,
                            mask_bytes=mask_bytes, attn_bytes=4)
    min_bq = min(len_q, _SUBLANE)
    while block_b > 1 and est(block_b, min_bq) > budget:
        block_b = max(1, block_b // 2)
    if len_q <= _SUBLANE:
        block_q = len_q                      # full dim -> always a legal tile
    else:
        block_q = min(512, (len_q // _SUBLANE) * _SUBLANE)
        while block_q > _SUBLANE and est(block_b, block_q) > budget:
            block_q -= _SUBLANE
    return block_b, block_q


def _legalize_block_q(block_q, len_q):
    block_q = max(1, min(block_q, len_q))
    if block_q == len_q or block_q % _SUBLANE == 0:
        return block_q
    down = (block_q // _SUBLANE) * _SUBLANE
    return down if down >= _SUBLANE else len_q


# ----------------------------------------------------------------------------
# Kernel body (batched over block_b batch entries per grid step)
# ----------------------------------------------------------------------------
def _sdpa_kernel(*refs, inv_temp, mask_mode, emit_attn):
    if mask_mode == "none":
        q_ref, kt_ref, v_ref = refs[:3]
        mask_ref, rest = None, refs[3:]
    else:
        q_ref, kt_ref, v_ref, mask_ref = refs[:4]
        rest = refs[4:]
    out_ref = rest[0]
    attn_ref = rest[1] if emit_attn else None

    # (Bb, bq, dk) x (Bb, dk, lk) -> (Bb, bq, lk); f32 accumulation on the MXU,
    # no explicit transpose (K arrives pre-transposed, lane-dense).
    s = jax.lax.dot_general(
        q_ref[...], kt_ref[...],
        dimension_numbers=(((2,), (1,)), ((0,), (0,))),
        preferred_element_type=jnp.float32,
    ) * jnp.float32(inv_temp)

    if mask_mode == "bool":
        # bool mask arrives as int8; non-zero = masked position (torch masked_fill).
        s = jnp.where(mask_ref[...] != 0, jnp.float32(-1e10), s)
    elif mask_mode == "add":
        # non-bool mask is additive (torch `attn = attn + mask` branch).
        s = s + mask_ref[...].astype(jnp.float32)

    m = jnp.max(s, axis=-1, keepdims=True)
    e = jnp.exp(s - m)
    denom = jnp.sum(e, axis=-1, keepdims=True)
    attn = e * pl.reciprocal(denom, approx=False)   # exact: stays within f32 tol

    if emit_attn:
        attn_ref[...] = attn.astype(attn_ref.dtype)

    out = jax.lax.dot_general(
        attn.astype(v_ref.dtype), v_ref[...],
        dimension_numbers=(((2,), (1,)), ((0,), (0,))),
        preferred_element_type=jnp.float32,
    )
    out_ref[...] = out.astype(out_ref.dtype)


# ----------------------------------------------------------------------------
# Wrapper
# ----------------------------------------------------------------------------
@functools.partial(
    jax.jit,
    static_argnames=("temperature", "block_q", "block_b", "use_bf16_matmul",
                     "return_attn"))
def scaled_dot_product_attention(q, k, v, mask=None, *, temperature,
                                 block_q=None, block_b=None,
                                 use_bf16_matmul=False, return_attn=True):
    sz_b, len_q, d_k = q.shape
    _, len_k, _ = k.shape
    d_v = v.shape[-1]
    inv_temp = 1.0 / float(temperature)
    out_dtype = q.dtype

    # ----- mask prep: no materialized broadcast/convert unless actually needed
    mask_mode = "none"
    mask_arg = None
    mask_bytes = 0
    if mask is not None:
        if mask.shape != (sz_b, len_q, len_k):
            mask = jnp.broadcast_to(mask, (sz_b, len_q, len_k))
        if mask.dtype == jnp.bool_:
            mask_mode = "bool"
            mask_arg = mask.astype(jnp.int8)       # 4x narrower than f32 stream
            mask_bytes = 1
        else:
            mask_mode = "add"
            mask_arg = mask.astype(jnp.float32)
            mask_bytes = 4

    if use_bf16_matmul:
        q = q.astype(jnp.bfloat16)
        k = k.astype(jnp.bfloat16)
        v = v.astype(jnp.bfloat16)

    # Lane-dense K: (B, d_k, len_k) puts len_k on lanes.
    kt = jnp.swapaxes(k, 1, 2)

    qkv_bytes = q.dtype.itemsize
    auto_bb, auto_bq = _pick_blocks(sz_b, len_q, len_k, d_k, d_v,
                                    qkv_bytes, mask_bytes, _VMEM_BUDGET)
    if block_b is None:
        block_b = auto_bb
    if block_q is None:
        block_q = auto_bq
    block_b = max(1, min(int(block_b), sz_b))
    block_q = _legalize_block_q(int(block_q), len_q)

    grid = (pl.cdiv(sz_b, block_b), pl.cdiv(len_q, block_q))

    q_spec = pl.BlockSpec((block_b, block_q, d_k), lambda bi, qi: (bi, qi, 0))
    # K/V block indices are constant across the inner q-block axis, so Pallas
    # keeps them resident in VMEM instead of re-DMAing per q tile.
    kt_spec = pl.BlockSpec((block_b, d_k, len_k), lambda bi, qi: (bi, 0, 0))
    v_spec = pl.BlockSpec((block_b, len_k, d_v), lambda bi, qi: (bi, 0, 0))
    out_spec = pl.BlockSpec((block_b, block_q, d_v), lambda bi, qi: (bi, qi, 0))
    attn_spec = pl.BlockSpec((block_b, block_q, len_k), lambda bi, qi: (bi, qi, 0))
    mask_spec = pl.BlockSpec((block_b, block_q, len_k), lambda bi, qi: (bi, qi, 0))

    in_specs = [q_spec, kt_spec, v_spec]
    args = [q, kt, v]
    if mask_mode != "none":
        in_specs.append(mask_spec)
        args.append(mask_arg)

    if return_attn:
        out_shape = (jax.ShapeDtypeStruct((sz_b, len_q, d_v), out_dtype),
                     jax.ShapeDtypeStruct((sz_b, len_q, len_k), jnp.float32))
        out_specs = [out_spec, attn_spec]
    else:
        out_shape = jax.ShapeDtypeStruct((sz_b, len_q, d_v), out_dtype)
        out_specs = out_spec

    flops = 2 * sz_b * len_q * len_k * (d_k + d_v)
    transcendentals = sz_b * len_q * len_k
    bytes_accessed = (q.size * q.dtype.itemsize
                      + kt.size * kt.dtype.itemsize
                      + v.size * v.dtype.itemsize
                      + (mask_arg.size * mask_arg.dtype.itemsize
                         if mask_arg is not None else 0)
                      + sz_b * len_q * d_v * jnp.dtype(out_dtype).itemsize
                      + (sz_b * len_q * len_k * 4 if return_attn else 0))
    cost = pl.CostEstimate(flops=int(flops),
                           transcendentals=int(transcendentals),
                           bytes_accessed=int(bytes_accessed))

    kernel = functools.partial(_sdpa_kernel, inv_temp=inv_temp,
                               mask_mode=mask_mode, emit_attn=return_attn)

    result = pl.pallas_call(
        kernel,
        out_shape=out_shape,
        grid_spec=pltpu.PrefetchScalarGridSpec(
            num_scalar_prefetch=0,
            grid=grid,
            in_specs=in_specs,
            out_specs=out_specs,
        ),
        compiler_params=pltpu.CompilerParams(
            dimension_semantics=("parallel", "parallel"),
            vmem_limit_bytes=_VMEM_BUDGET),
        cost_estimate=cost,
    )(*args)

    # Attention dropout is identity in eval mode.
    if return_attn:
        out, attn = result
        return out, attn
    return result, None


# ----------------------------------------------------------------------------
# Pure-JAX reference (mirrors the torch forward, eval-mode dropout)
# ----------------------------------------------------------------------------
def reference(q, k, v, mask, temperature):
    attn = jnp.einsum("bqd,bkd->bqk", q, k) / temperature
    if mask is not None:
        if mask.dtype == jnp.bool_:
            attn = jnp.where(mask, jnp.float32(-1e10), attn)
        else:
            attn = attn + mask
    attn = jax.nn.softmax(attn, axis=-1)
    out = jnp.einsum("bqk,bkv->bqv", attn, v)
    return out, attn


if __name__ == "__main__":
    def check(name, got, want, rtol=1e-5, atol=1e-5):
        if not jnp.allclose(got, want, rtol=rtol, atol=atol):
            err = jnp.max(jnp.abs(got.astype(jnp.float32) - want.astype(jnp.float32)))
            raise AssertionError(f"{name}: mismatch, max abs err = {err}")

    # --- TGAT-native tiny shapes (n_head*sz_b=4, len=8, d=16) ---------------
    B, LEN_Q, LEN_K, D_K, D_V = 4, 8, 8, 16, 16
    temperature = math.sqrt(D_K)
    key = jax.random.PRNGKey(0)
    kq, kk, kv, km = jax.random.split(key, 4)
    q = jax.random.normal(kq, (B, LEN_Q, D_K), jnp.float32)
    k = jax.random.normal(kk, (B, LEN_K, D_K), jnp.float32)
    v = jax.random.normal(kv, (B, LEN_K, D_V), jnp.float32)
    bool_mask = jax.random.uniform(km, (B, LEN_Q, LEN_K)) < 0.3   # True = masked

    # 1) bool mask path (masked_fill -1e10)
    out, attn = scaled_dot_product_attention(q, k, v, bool_mask, temperature=temperature)
    out, attn = jax.block_until_ready(out), jax.block_until_ready(attn)
    out_r, attn_r = reference(q, k, v, bool_mask, temperature)
    check("bool-mask out", out, out_r)
    check("bool-mask attn", attn, attn_r)

    # 2) no-mask path
    out2, attn2 = scaled_dot_product_attention(q, k, v, None, temperature=temperature)
    out2, attn2 = jax.block_until_ready(out2), jax.block_until_ready(attn2)
    out2_r, attn2_r = reference(q, k, v, None, temperature)
    check("no-mask out", out2, out2_r)
    check("no-mask attn", attn2, attn2_r)

    # 3) additive float mask path (torch `attn = attn + mask` branch)
    add_mask = jnp.where(bool_mask, jnp.float32(-1e4), jnp.float32(0.0))
    out3, attn3 = scaled_dot_product_attention(q, k, v, add_mask, temperature=temperature)
    out3, attn3 = jax.block_until_ready(out3), jax.block_until_ready(attn3)
    out3_r, attn3_r = reference(q, k, v, add_mask, temperature)
    check("add-mask out", out3, out3_r)
    check("add-mask attn", attn3, attn3_r)

    # 4) medium shapes with a ragged q tail (exercises cdiv grid + batch blocking)
    B2, LQ2, LK2, DK2, DV2 = 2, 100, 64, 32, 32
    temperature2 = math.sqrt(DK2)
    kq2, kk2, kv2, km2 = jax.random.split(jax.random.PRNGKey(1), 4)
    q2 = jax.random.normal(kq2, (B2, LQ2, DK2), jnp.float32)
    k2 = jax.random.normal(kk2, (B2, LK2, DK2), jnp.float32)
    v2 = jax.random.normal(kv2, (B2, LK2, DV2), jnp.float32)
    m2 = jax.random.uniform(km2, (B2, LQ2, LK2)) < 0.25
    out4, attn4 = scaled_dot_product_attention(q2, k2, v2, m2, temperature=temperature2)
    out4, attn4 = jax.block_until_ready(out4), jax.block_until_ready(attn4)
    out4_r, attn4_r = reference(q2, k2, v2, m2, temperature2)
    check("medium out", out4, out4_r)
    check("medium attn", attn4, attn4_r)

    print("KERNEL_OK")
</pallas_src>

<mosaic_0001>
module attributes {stable_mosaic.version = 11 : i64} {
  func.func @_sdpa_kernel(%arg0: i32, %arg1: i32, %arg2: memref<4x8x16xf32, #tpu.memory_space<vmem>>, %arg3: memref<4x16x8xf32, #tpu.memory_space<vmem>>, %arg4: memref<4x8x16xf32, #tpu.memory_space<vmem>>, %arg5: memref<4x8x8xi8, #tpu.memory_space<vmem>>, %arg6: memref<4x8x16xf32, #tpu.memory_space<vmem>>, %arg7: memref<4x8x8xf32, #tpu.memory_space<vmem>>) attributes {dimension_semantics = [#tpu.dimension_semantics<parallel>, #tpu.dimension_semantics<parallel>], iteration_bounds = array<i64: 1, 1>, scalar_prefetch = 0 : i64, scratch_operands = 0 : i64, tpu.core_type = #tpu.core_type<tc>, window_params = [{transform_indices = @transform_0, window_bounds = array<i64: 4, 8, 16>}, {transform_indices = @transform_1, window_bounds = array<i64: 4, 16, 8>}, {transform_indices = @transform_2, window_bounds = array<i64: 4, 8, 16>}, {transform_indices = @transform_3, window_bounds = array<i64: 4, 8, 8>}, {transform_indices = @transform_4, window_bounds = array<i64: 4, 8, 16>}, {transform_indices = @transform_5, window_bounds = array<i64: 4, 8, 8>}]} {
    %c0 = arith.constant 0 : index
    %c0_0 = arith.constant 0 : index
    %c0_1 = arith.constant 0 : index
    %0 = vector.load %arg2[%c0, %c0_0, %c0_1] : memref<4x8x16xf32, #tpu.memory_space<vmem>>, vector<4x8x16xf32>
    %c0_2 = arith.constant 0 : index
    %c0_3 = arith.constant 0 : index
    %c0_4 = arith.constant 0 : index
    %1 = vector.load %arg3[%c0_2, %c0_3, %c0_4] : memref<4x16x8xf32, #tpu.memory_space<vmem>>, vector<4x16x8xf32>
    %cst = arith.constant dense<0.000000e+00> : vector<4x8x8xf32>
    %2 = tpu.matmul %0, %1, %cst {dimension_numbers = #tpu.dot_dimension_numbers<[2], [1], [1], [2], [0, 0, 0, 1, 1, 2], [0], [0]>} : vector<4x8x16xf32>, vector<4x16x8xf32>, vector<4x8x8xf32> -> vector<4x8x8xf32>
    %cst_5 = arith.constant 2.500000e-01 : f32
    %3 = vector.broadcast %cst_5 : f32 to vector<4x8x8xf32>
    %4 = arith.mulf %2, %3 : vector<4x8x8xf32>
    %c0_6 = arith.constant 0 : index
    %c0_7 = arith.constant 0 : index
    %c0_8 = arith.constant 0 : index
    %5 = vector.load %arg5[%c0_6, %c0_7, %c0_8] : memref<4x8x8xi8, #tpu.memory_space<vmem>>, vector<4x8x8xi8>
    %c0_i8 = arith.constant 0 : i8
    %6 = vector.broadcast %c0_i8 : i8 to vector<4x8x8xi8>
    %7 = arith.cmpi ne, %5, %6 : vector<4x8x8xi8>
    %cst_9 = arith.constant -1.000000e+10 : f32
    %8 = vector.broadcast %cst_9 : f32 to vector<4x8x8xf32>
    %9 = arith.select %7, %8, %4 : vector<4x8x8xi1>, vector<4x8x8xf32>
    %cst_10 = arith.constant dense<0xFF800000> : vector<4x8xf32>
    %10 = vector.multi_reduction <maximumf>, %9, %cst_10 [2] : vector<4x8x8xf32> to vector<4x8xf32>
    %11 = vector.shape_cast %10 : vector<4x8xf32> to vector<4x8x1xf32>
    %12 = vector.broadcast %11 : vector<4x8x1xf32> to vector<4x8x8xf32>
    %13 = arith.subf %9, %12 : vector<4x8x8xf32>
    %14 = math.exp %13 : vector<4x8x8xf32>
    %cst_11 = arith.constant dense<0.000000e+00> : vector<4x8xf32>
    %15 = vector.multi_reduction <add>, %14, %cst_11 [2] : vector<4x8x8xf32> to vector<4x8xf32>
    %16 = vector.shape_cast %15 : vector<4x8xf32> to vector<4x8x1xf32>
    %17 = tpu.reciprocal %16 : vector<4x8x1xf32> -> vector<4x8x1xf32>
    %18 = vector.broadcast %17 : vector<4x8x1xf32> to vector<4x8x8xf32>
    %19 = arith.mulf %14, %18 : vector<4x8x8xf32>
    %c0_12 = arith.constant 0 : index
    %c0_13 = arith.constant 0 : index
    %c0_14 = arith.constant 0 : index
    %20 = vector.load %arg7[%c0_12, %c0_13, %c0_14] : memref<4x8x8xf32, #tpu.memory_space<vmem>>, vector<4x8x8xf32>
    tpu.vector_store %arg7[%c0_12, %c0_13, %c0_14], %19 {strides = array<i32>} : memref<4x8x8xf32, #tpu.memory_space<vmem>>, vector<4x8x8xf32>,
    %c0_15 = arith.constant 0 : index
    %c0_16 = arith.constant 0 : index
    %c0_17 = arith.constant 0 : index
    %21 = vector.load %arg4[%c0_15, %c0_16, %c0_17] : memref<4x8x16xf32, #tpu.memory_space<vmem>>, vector<4x8x16xf32>
    %cst_18 = arith.constant dense<0.000000e+00> : vector<4x8x16xf32>
    %22 = tpu.matmul %19, %21, %cst_18 {dimension_numbers = #tpu.dot_dimension_numbers<[2], [1], [1], [2], [0, 0, 0, 1, 1, 2], [0], [0]>} : vector<4x8x8xf32>, vector<4x8x16xf32>, vector<4x8x16xf32> -> vector<4x8x16xf32>
    %c0_19 = arith.constant 0 : index
    %c0_20 = arith.constant 0 : index
    %c0_21 = arith.constant 0 : index
    %23 = vector.load %arg6[%c0_19, %c0_20, %c0_21] : memref<4x8x16xf32, #tpu.memory_space<vmem>>, vector<4x8x16xf32>
    tpu.vector_store %arg6[%c0_19, %c0_20, %c0_21], %22 {strides = array<i32>} : memref<4x8x16xf32, #tpu.memory_space<vmem>>, vector<4x8x16xf32>,
    return
  }
  func.func @transform_0(%arg0: i32, %arg1: i32) -> (i32, i32, i32) {
    %c0_i32 = arith.constant 0 : i32
    %c0_i32_0 = arith.constant 0 : i32
    return %arg0, %arg1, %c0_i32 : i32, i32, i32
  }
  func.func @transform_1(%arg0: i32, %arg1: i32) -> (i32, i32, i32) {
    %c0_i32 = arith.constant 0 : i32
    %c0_i32_0 = arith.constant 0 : i32
    %c0_i32_1 = arith.constant 0 : i32
    return %arg0, %c0_i32, %c0_i32_0 : i32, i32, i32
  }
  func.func @transform_2(%arg0: i32, %arg1: i32) -> (i32, i32, i32) {
    %c0_i32 = arith.constant 0 : i32
    %c0_i32_0 = arith.constant 0 : i32
    %c0_i32_1 = arith.constant 0 : i32
    return %arg0, %c0_i32, %c0_i32_0 : i32, i32, i32
  }
  func.func @transform_3(%arg0: i32, %arg1: i32) -> (i32, i32, i32) {
    %c0_i32 = arith.constant 0 : i32
    %c0_i32_0 = arith.constant 0 : i32
    return %arg0, %arg1, %c0_i32 : i32, i32, i32
  }
  func.func @transform_4(%arg0: i32, %arg1: i32) -> (i32, i32, i32) {
    %c0_i32 = arith.constant 0 : i32
    %c0_i32_0 = arith.constant 0 : i32
    return %arg0, %arg1, %c0_i32 : i32, i32, i32
  }
  func.func @transform_5(%arg0: i32, %arg1: i32) -> (i32, i32, i32) {
    %c0_i32 = arith.constant 0 : i32
    %c0_i32_0 = arith.constant 0 : i32
    return %arg0, %arg1, %c0_i32 : i32, i32, i32
  }
}

</mosaic_0001>

<bundles_post_ra>
// kernel: scaled_dot_product_attention.1
= control target key start
LH: loop header
LB: loop body
LE: loop exit
PB: predicated region body
PF: predicated region fallthrough
CT: control target
= control target key end

     0   :  { %11 = vsyncpa [#allocation3], 0  ;;  %v897_v2 = vmov 0.0|0.0   ;;  %vm898_vm0 = vmmov 0   ;;  %v899_v4 = vmov 0.0   ;;  %vm35_vm1 = vcmask 130048   ;;  %s1069_s0 = inlined_call_operand.vmem [shape: f32[4,8,16], index: 0, kind: input, shape index: {}]   ;;  %s1070_s1 = inlined_call_operand.vmem [shape: f32[4,16,8], index: 1, kind: input, shape index: {}]   ;;  %s1071_s2 = inlined_call_operand.vmem [shape: f32[4,8,16], index: 2, kind: input, shape index: {}]   ;;  %s1072_s3 = inlined_call_operand.vmem [shape: s8[4,8,8], index: 3, kind: input, shape index: {}]   ;;  %s1073_s4 = inlined_call_operand.hbm [shape: f32[4,8,16], index: 4, kind: output, shape index: {0}]   ;;  %s1074_s5 = inlined_call_operand.hbm [shape: f32[4,8,8], index: 5, kind: output, shape index: {1}]  }
   0x1   :  { %v27_v0 = vld [vmem:[%s1070_s1] sm:$0xff]  ;;  %v28_v1 = vld [vmem:[%s1070_s1 + $0x8] sm:$0xff]  ;;  %813 = vmatprep.subr.bf16.mxu0 %v897_v2  ;;  %769 = vmatprep.mubr.msk.f32.mxu0 %vm898_vm0, %v899_v4  ;;  %v29_v5 = vld [vmem:[%s1070_s1 + $0x10] sm:$0xff] }
   0x2   :  { %v814_v3 = vpack.c.bf16 %v28_v1, %v27_v0  ;;  %v30_v6 = vld [vmem:[%s1070_s1 + $0x18] sm:$0xff]  ;;  %v31_v7 = vld [vmem:[%s1070_s1 + $0x20] sm:$0xff]  ;;  %816 = vmatprep.subr.bf16.mxu1 %v897_v2  ;;  %v32_v9 = vld [vmem:[%s1070_s1 + $0x28] sm:$0xff]  ;;  %776 = vmatprep.mubr.msk.f32.mxu1 %vm898_vm0, %v899_v4 }
   0x3   :  { %v817_v8 = vpack.c.bf16 %v30_v6, %v29_v5  ;;  %v23_v10 = vld [vmem:[%s1069_s0] sm:$0xff]  ;;  %v820_v11 = vpack.c.bf16 %v32_v9, %v31_v7  ;;  %v33_v12 = vld [vmem:[%s1070_s1 + $0x30] sm:$0xff]  ;;  %v34_v13 = vld [vmem:[%s1070_s1 + $0x38] sm:$0xff] }
   0x4   :  { %815 = vmatpush3.bf16.msra.mxu0 %v814_v3 }
   0x5   :  { %819 = vmatprep.subr.bf16.mxu0 %v897_v2  ;;  %818 = vmatpush3.bf16.msra.mxu1 %v817_v8 }
   0x6   :  { %12 = vsyncpa [#allocation5], 0  ;;  %v24_v14 = vld [vmem:[%s1069_s0 + $0x8] sm:$0xff]  ;;  %822 = vmatprep.subr.bf16.mxu1 %v897_v2  ;;  %v823_v15 = vpack.c.bf16 %v34_v13, %v33_v12  ;;  %v25_v16 = vld [vmem:[%s1069_s0 + $0x10] sm:$0xff]  ;;  %v900_v21 = vmov 0   ;;  %vm356_vm7 = vcmask 64512  }
   0x7   :  { %770 = vmatmul.mubr.msk.f32.vlgmr.msra.gmra.mrb[0].mxu0 %vm35_vm1, %v23_v10  ;;  %v26_v17 = vld [vmem:[%s1069_s0 + $0x18] sm:$0xff]  ;;  %v332_v18 = vld [vmem:[%s1072_s3] sm:$0x3]  ;;  %v333_v19 = vld [vmem:[%s1072_s3 + $0x2] sm:$0x3] }
   0x8   :  { %821 = vmatpush3.bf16.msra.mxu0 %v820_v11  ;;  %783 = vmatprep.mubr.msk.f32.mxu0 %vm898_vm0, %v899_v4  ;;  %vm336_vm2 = vnez %v332_v18  ;;  %v334_v20 = vld [vmem:[%s1072_s3 + $0x4] sm:$0x3]  ;;  %vm337_vm3 = vnez %v333_v19  ;;  %v335_v23 = vld [vmem:[%s1072_s3 + $0x6] sm:$0x3]  ;;  %v406_v9 = vld [vmem:[%s1071_s2 + $0x8] sm:$0xff] }
   0x9   :  { %777 = vmatmul.mubr.msk.f32.vlgmr.msra.gmra.mrb[0].mxu1 %vm35_vm1, %v24_v14  ;;  %793 = vmatprep.subr.mxu0 %v899_v4  ;;  %v340_v22 = vsel %vm336_vm2, 16843009, %v900_v21  ;;  %vm338_vm4 = vnez %v334_v20  ;;  %v341_v24 = vsel %vm337_vm3, 16843009, %v900_v21  ;;  %vm339_vm5 = vnez %v335_v23  ;;  %v405_v8 = vld [vmem:[%s1071_s2] sm:$0xff]  ;;  %v408_v20 = vld [vmem:[%s1071_s2 + $0x18] sm:$0xff] }
   0xa   :  { %824 = vmatpush3.bf16.msra.mxu1 %v823_v15  ;;  %790 = vmatprep.mubr.msk.f32.mxu1 %vm898_vm0, %v899_v4  ;;  %v344_v25 = vunpack.c.0.s8 %v340_v22  ;;  %v342_v26 = vsel %vm338_vm4, 16843009, %v900_v21  ;;  %v345_v27 = vunpack.c.0.s8 %v341_v24  ;;  %v343_v28 = vsel %vm339_vm5, 16843009, %v900_v21 }
   0xb   :  { %784 = vmatmul.mubr.msk.f32.vlgmr.msra.gmra.mrb[2].mxu0 %vm35_vm1, %v25_v16  ;;  %798 = vmatprep.subr.mxu1 %v899_v4  ;;  %v346_v30 = vunpack.c.0.s8 %v342_v26  ;;  %v347_v34 = vunpack.c.0.s8 %v343_v28  ;;  %v407_v16 = vld [vmem:[%s1071_s2 + $0x10] sm:$0xff]  ;;  %s901_s2 = smov [#allocation4]  }
   0xc   :  { %795 = vmatprep.mubr.msk.f32.mxu0 %vm898_vm0, %v899_v4  ;;  %vm348_vm6 = vcmp.ne.s32.totalorder %v344_v25, 0  ;;  %vm349_vm8 = vcmp.ne.s32.totalorder %v345_v27, 0  ;;  %794 = vmatpush3.msra.mxu0 %v405_v8  ;;  %s722_s30 = sshll.u32 %s901_s2, 4  ;;  %s723_s30 = int_to_ptr.vmem [resolvable:$true] %s722_s30 }
   0xd   :  { %791 = vmatmul.mubr.msk.f32.vlgmr.msra.gmra.mrb[2].mxu1 %vm35_vm1, %v26_v17  ;;  %vm350_vm9 = vcmp.ne.s32.totalorder %v346_v30, 0  ;;  %vm351_vm10 = vcmp.ne.s32.totalorder %v347_v34, 0  ;;  %803 = vmatprep.subr.mxu0 %v899_v4  ;;  %s849_s6 = scalar_lea.vmem %s723_s30, 512  ;;  %p854_p1 = scmp.lt.s32.totalorder %s723_s30, %s723_s30 }
   0xe   :  { %800 = vmatprep.mubr.msk.f32.mxu1 %vm898_vm0, %v899_v4  ;;  %799 = vmatpush3.msra.mxu1 %v406_v9  ;;  %p850_p0 = scmp.ne.s32.totalorder %s723_s30, %s849_s6  ;;  %p855_p2 = scmp.lt.s32.totalorder %s849_s6, %s849_s6 }
   0xf   :  { %808 = vmatprep.subr.mxu1 %v899_v4 }
  0x10   :  { %p856_p3 = por %p855_p2, %p854_p1 }
  0x12   :  { %p857_p4 = pnand %p856_p3, %p850_p0 }
  0xda   :  { %v105_v29 = vpop.f32.mrb[0].mxu0 }
  0xdb   :  { %v328_v31 = vmul.f32 0.25, %v105_v29  ;;  %v771_v32 = vpop.f32.mrb[1].mxu0 }
  0xdc   :  { %v178_v33 = vpop.f32.mrb[0].mxu1 }
  0xdd   :  { %v329_v35 = vmul.f32 0.25, %v178_v33  ;;  %v778_v36 = vpop.f32.mrb[1].mxu1  ;;  %v352_v37 = vsel %vm348_vm6, -1e+10, %v328_v31 }
  0xde   :  { %v251_v38 = vpop.f32.mrb[2].mxu0  ;;  %v357_v39 = vsel %vm356_vm7, %v352_v37, -inf }
  0xdf   :  { %v330_v40 = vmul.f32 0.25, %v251_v38  ;;  %358 = vmax.xlane.f32.xlu0 %v357_v39  ;;  %v785_v41 = vpop.f32.mrb[3].mxu0  ;;  %v353_v42 = vsel %vm349_vm8, -1e+10, %v329_v35 }
  0xe0   :  { %v324_v43 = vpop.f32.mrb[2].mxu1  ;;  %v360_v44 = vsel %vm356_vm7, %v353_v42, -inf }
  0xe1   :  { %v331_v45 = vmul.f32 0.25, %v324_v43  ;;  %v792_v46 = vpop.f32.mrb[3].mxu1  ;;  %v354_v47 = vsel %vm350_vm9, -1e+10, %v330_v40 }
  0xe2   :  { %v363_v48 = vsel %vm356_vm7, %v354_v47, -inf }
  0xe3   :  { %361 = vmax.xlane.f32.xlu0 %v360_v44  ;;  %364 = vmax.xlane.f32.xlu1 %v363_v48  ;;  %v355_v49 = vsel %vm351_vm10, -1e+10, %v331_v45 }
  0xe4   :  { %v366_v50 = vsel %vm356_vm7, %v355_v49, -inf }
  0xe7   :  { %367 = vmax.xlane.f32.xlu1 %v366_v50 }
 0x16c   :  { %v359_v51 = vpop.xlane.xlu0 %358 }
 0x16d   :  { %v369_v52 = vsub.f32 %v352_v37, %v359_v51 }
 0x16f   :  { %v373_v53 = vmul.f32 1.442695, %v369_v52 }
 0x170   :  { %v362_v54 = vpop.xlane.xlu0 %361  ;;  %v365_v55 = vpop.xlane.xlu1 %364 }
 0x171   :  { %833 = vpow2.f32 %v373_v53  ;;  %v370_v56 = vsub.f32 %v353_v42, %v362_v54  ;;  %v371_v57 = vsub.f32 %v354_v47, %v365_v55 }
 0x173   :  { %v375_v58 = vmul.f32 1.442695, %v370_v56  ;;  %v377_v59 = vmul.f32 1.442695, %v371_v57 }
 0x174   :  { %v368_v60 = vpop.xlane.xlu1 %367 }
 0x175   :  { %835 = vpow2.f32 %v375_v58  ;;  %v372_v61 = vsub.f32 %v355_v49, %v368_v60 }
 0x176   :  { %837 = vpow2.f32 %v377_v59 }
 0x177   :  { %v379_v62 = vmul.f32 1.442695, %v372_v61 }
 0x179   :  { %839 = vpow2.f32 %v379_v62 }
 0x17b   :  { %v834_v63 = vpop.eup %833 }
 0x17c   :  { %v381_v0 = vsel %vm356_vm7, %v834_v63, 0.0 }
 0x17d   :  { %382 = vadd.xlane.f32.xlu0 %v381_v0 }
 0x17f   :  { %v836_v1 = vpop.eup %835 }
 0x180   :  { %v838_v2 = vpop.eup %837  ;;  %v384_v3 = vsel %vm356_vm7, %v836_v1, 0.0 }
 0x181   :  { %385 = vadd.xlane.f32.xlu1 %v384_v3  ;;  %v387_v5 = vsel %vm356_vm7, %v838_v2, 0.0 }
 0x182   :  { %388 = vadd.xlane.f32.xlu0 %v387_v5 }
 0x183   :  { %v840_v6 = vpop.eup %839 }
 0x184   :  { %v390_v7 = vsel %vm356_vm7, %v840_v6, 0.0 }
 0x185   :  { %391 = vadd.xlane.f32.xlu1 %v390_v7 }
 0x20a   :  { %v383_v10 = vpop.xlane.xlu0 %382 }
 0x20b   :  { %841 = vrcp.f32 %v383_v10 }
 0x20e   :  { %v386_v11 = vpop.xlane.xlu1 %385 }
 0x20f   :  { %v389_v12 = vpop.xlane.xlu0 %388  ;;  %843 = vrcp.f32 %v386_v11 }
 0x210   :  { %845 = vrcp.f32 %v389_v12 }
 0x212   :  { %v392_v13 = vpop.xlane.xlu1 %391 }
 0x213   :  { %847 = vrcp.f32 %v392_v13 }
 0x215   :  { %v842_v14 = vpop.eup %841 }
 0x216   :  { %v397_v15 = vmul.f32 %v842_v14, %v834_v63 }
 0x218   :  { %401 = vst.msk [vmem:[#allocation4] sm:$0xff] %vm356_vm7, %v397_v15  ;;  %796 = vmatmul.mubr.msk.f32.vlgmr.msra.gmra.mrb[4].mxu0 %vm356_vm7, %v397_v15 }
 0x219   :  { %v844_v17 = vpop.eup %843  ;;  %804 = vmatpush3.msra.mxu0 %v407_v16  ;;  %805 = vmatprep.mubr.msk.f32.mxu0 %vm898_vm0, %v899_v4 }
 0x21a   :  { %v846_v18 = vpop.eup %845  ;;  %v398_v19 = vmul.f32 %v844_v17, %v836_v1 }
 0x21b   :  { %v399_v21 = vmul.f32 %v846_v18, %v838_v2 }
 0x21c   :  { %402 = vst.msk [vmem:[#allocation4 + $0x8] sm:$0xff] %vm356_vm7, %v398_v19  ;;  %801 = vmatmul.mubr.msk.f32.vlgmr.msra.gmra.mrb[4].mxu1 %vm356_vm7, %v398_v19 }
 0x21d   :  { %v848_v22 = vpop.eup %847  ;;  %403 = vst.msk [vmem:[#allocation4 + $0x10] sm:$0xff] %vm356_vm7, %v399_v21  ;;  %806 = vmatmul.mubr.msk.f32.vlgmr.msra.gmra.mrb[6].mxu0 %vm356_vm7, %v399_v21  ;;  %809 = vmatpush3.msra.mxu1 %v408_v20 }
 0x21e   :  { %v400_v23 = vmul.f32 %v848_v22, %v840_v6  ;;  %810 = vmatprep.mubr.msk.f32.mxu1 %vm898_vm0, %v899_v4 }
 0x220   :  { %404 = vst.msk [vmem:[#allocation4 + $0x18] sm:$0xff] %vm356_vm7, %v400_v23  ;;  %811 = vmatmul.mubr.msk.f32.vlgmr.msra.gmra.mrb[6].mxu1 %vm356_vm7, %v400_v23 }
 0x221   :  { %860 = shalt.err (!%p857_p4)
}
 0x222   :  { %s861_s9 = scalar_lea.hbm %s1074_s5, 512 }
 0x223   :  { %p862_p5 = scmp.ne.s32.totalorder %s1074_s5, %s861_s9  ;;  %p865_p6 = scmp.lt.u32.totalorder %s861_s9, %s1074_s5 }
 0x225   :  { %p867_p7 = pnand %p865_p6, %p862_p5 }
 0x227   :  { %870 = shalt.err (!%p867_p7)
}
 0x228   :  { %s902_s14 = smov 128   ;;  %s903_s1 = smov 8  }
 0x229   :  { %728 = dma.vmem_to_hbm [thread:$0]  %s723_s30, 512, %s1074_s5, [#allocation5], %s902_s14, %s902_s14, %s903_s1  }
 0x22a   :  { %s904_s17 = smov [#allocation2]  }
 0x22b   :  { %s710_s18 = sshll.u32 %s904_s17, 4  ;;  %s711_s18 = int_to_ptr.vmem [resolvable:$true] %s710_s18 }
 0x22c   :  { %s871_s5 = scalar_lea.vmem %s711_s18, 512  ;;  %p876_p9 = scmp.lt.s32.totalorder %s711_s18, %s711_s18 }
 0x22d   :  { %p872_p8 = scmp.ne.s32.totalorder %s711_s18, %s871_s5  ;;  %p877_p10 = scmp.lt.s32.totalorder %s871_s5, %s871_s5 }
 0x22f   :  { %p878_p11 = por %p877_p10, %p876_p9 }
 0x231   :  { %p879_p12 = pnand %p878_p11, %p872_p8 }
 0x2eb   :  { %v478_v4 = vpop.f32.mrb[4].mxu0 }
 0x2ec   :  { %701 = vst.msk [vmem:[#allocation2] sm:$0xff] %vm35_vm1, %v478_v4  ;;  %v797_v24 = vpop.f32.mrb[5].mxu0 }
 0x2ef   :  { %v551_v25 = vpop.f32.mrb[4].mxu1 }
 0x2f0   :  { %702 = vst.msk [vmem:[#allocation2 + $0x8] sm:$0xff] %vm35_vm1, %v551_v25  ;;  %v624_v26 = vpop.f32.mrb[6].mxu0  ;;  %v802_v27 = vpop.f32.mrb[5].mxu1 }
 0x2f1   :  { %703 = vst.msk [vmem:[#allocation2 + $0x10] sm:$0xff] %vm35_vm1, %v624_v26  ;;  %v807_v28 = vpop.f32.mrb[7].mxu0 }
 0x2f3   :  { %v697_v29 = vpop.f32.mrb[6].mxu1 }
 0x2f4   :  { %704 = vst.msk [vmem:[#allocation2 + $0x18] sm:$0xff] %vm35_vm1, %v697_v29  ;;  %v812_v30 = vpop.f32.mrb[7].mxu1 }
 0x2f5   :  { %882 = shalt.err (!%p879_p12)
}
 0x2f6   :  { %s883_s20 = scalar_lea.hbm %s1073_s4, 512 }
 0x2f7   :  { %p884_p13 = scmp.ne.s32.totalorder %s1073_s4, %s883_s20  ;;  %p887_p0 = scmp.lt.u32.totalorder %s883_s20, %s1073_s4 }
 0x2f9   :  { %p889_p1 = pnand %p887_p0, %p884_p13 }
 0x2fb   :  { %892 = shalt.err (!%p889_p1)
}
 0x2fc   :  { %716 = dma.vmem_to_hbm [thread:$0]  %s711_s18, 512, %s1073_s4, [#allocation3], %s902_s14, %s902_s14, %s903_s1  }
 0x2fd   :  { %893 = dma.done.wait [#allocation3], 512  }
 0x2fe   :  { %894 = vsyncadd [#allocation3], 4294966784 }
 0x2ff   :  { %895 = dma.done.wait [#allocation5], 512  }
 0x300   :  { %896 = vsyncadd [#allocation5], 4294966784 }
 0x301   :  { %735 = vsyncpa [#allocation3], 1 }
 0x302   :  { %736 = vsyncpa [#allocation5], 1 }

</bundles_post_ra>
